<compile_context>
chip_gen: v6e
topology: v6e:2x2x1
jax: 0.10.0
libtpu: 0.0.40
codegen_flags: <defaults>
</compile_context>

<pallas_src>
import jax
import jax.numpy as jnp
from jax.experimental import pallas as pl
from jax.experimental.pallas import tpu as pltpu

MAX_TROWS = 2048   # rows per grid step at large N (HBM-roofline friendly)
SUBLANE = 8


def _round_up(n, m):
    return ((n + m - 1) // m) * m


def _choose_trows(n):
    if n <= MAX_TROWS:
        return _round_up(max(n, SUBLANE), SUBLANE)
    return MAX_TROWS


# ----------------------------------------------------------------------------
# Pallas kernel: fused fc1 -> ReLU -> (mu head, logvar head)
# ----------------------------------------------------------------------------

def _zprior_kernel(x_ref, w1_ref, b1_ref, w2m_ref, b2m_ref, w2l_ref, b2l_ref,
                   mu_ref, lv_ref):
    # x: (T, in) bf16, w1: (in, H) bf16, b1: (1, H) f32
    # w2m/w2l: (H, C) bf16, b2m/b2l: (1, C) f32
    h = jnp.dot(x_ref[...], w1_ref[...], preferred_element_type=jnp.float32)
    h = jnp.maximum(h + b1_ref[...], 0.0)           # f32 epilogue (v5e-safe)
    h_bf = h.astype(jnp.bfloat16)                   # narrow MXU operand only
    mu = jnp.dot(h_bf, w2m_ref[...], preferred_element_type=jnp.float32)
    lv = jnp.dot(h_bf, w2l_ref[...], preferred_element_type=jnp.float32)
    mu_ref[...] = mu + b2m_ref[...]
    lv_ref[...] = lv + b2l_ref[...]


def _zprior_apply(x2d_bf16, packed):
    n, in_size = x2d_bf16.shape
    hid = packed["w1t"].shape[1]
    c = packed["w2t_mu"].shape[1]

    trows = _choose_trows(n)
    n_pad = _round_up(n, trows)
    if n_pad != n:
        x2d_bf16 = jnp.pad(x2d_bf16, ((0, n_pad - n), (0, 0)))
    grid = (n_pad // trows,)

    flops = 2 * n_pad * (in_size * hid + hid * 2 * c)
    bytes_accessed = (n_pad * in_size * 2                 # x (bf16)
                      + (in_size * hid + 2 * hid * c) * 2 # weights (bf16)
                      + (hid + 2 * c) * 4                 # biases (f32)
                      + 2 * n_pad * c * 4)                # mu + logvar (f32)

    mu, lv = pl.pallas_call(
        _zprior_kernel,
        grid=grid,
        in_specs=[
            pl.BlockSpec((trows, in_size), lambda i: (i, 0)),   # x rows advance
            pl.BlockSpec((in_size, hid), lambda i: (0, 0)),     # weights resident
            pl.BlockSpec((1, hid), lambda i: (0, 0)),
            pl.BlockSpec((hid, c), lambda i: (0, 0)),
            pl.BlockSpec((1, c), lambda i: (0, 0)),
            pl.BlockSpec((hid, c), lambda i: (0, 0)),
            pl.BlockSpec((1, c), lambda i: (0, 0)),
        ],
        out_specs=[
            pl.BlockSpec((trows, c), lambda i: (i, 0)),
            pl.BlockSpec((trows, c), lambda i: (i, 0)),
        ],
        out_shape=[
            jax.ShapeDtypeStruct((n_pad, c), jnp.float32),
            jax.ShapeDtypeStruct((n_pad, c), jnp.float32),
        ],
        compiler_params=pltpu.CompilerParams(
            dimension_semantics=("parallel",)),
        cost_estimate=pl.CostEstimate(flops=flops, transcendentals=0,
                                      bytes_accessed=bytes_accessed),
    )(x2d_bf16, packed["w1t"], packed["b1"],
      packed["w2t_mu"], packed["b2_mu"],
      packed["w2t_lv"], packed["b2_lv"])
    return mu[:n], lv[:n]


# ----------------------------------------------------------------------------
# Parameters (PyTorch layout) and one-time packing into kernel-friendly layout
# ----------------------------------------------------------------------------

def init_params(key, input_size, hidden_size, code_size):
    k1, k2, k3, k4 = jax.random.split(key, 4)
    out_size = 2 * code_size
    return {
        "fc1_w": jax.random.normal(k1, (hidden_size, input_size), jnp.float32) * 0.1,
        "fc1_b": jax.random.normal(k2, (hidden_size,), jnp.float32) * 0.1,
        "fc2_w": jax.random.normal(k3, (out_size, hidden_size), jnp.float32) * 0.1,
        "fc2_b": jax.random.normal(k4, (out_size,), jnp.float32) * 0.1,
    }


def pack_params(params):
    """Pre-transpose to (in, out), split fc2 into mu/logvar heads, bf16 matmul
    operands (biases stay f32 for the f32 accumulate/epilogue)."""
    hid = params["fc1_w"].shape[0]
    out_size = params["fc2_w"].shape[0]
    c = out_size // 2
    w1t = jnp.transpose(params["fc1_w"]).astype(jnp.bfloat16)          # (in, H)
    b1 = params["fc1_b"].reshape(1, hid).astype(jnp.float32)           # (1, H)
    w2t_mu = jnp.transpose(params["fc2_w"][:c]).astype(jnp.bfloat16)   # (H, C)
    w2t_lv = jnp.transpose(params["fc2_w"][c:]).astype(jnp.bfloat16)   # (H, C)
    b2_mu = params["fc2_b"][:c].reshape(1, c).astype(jnp.float32)
    b2_lv = params["fc2_b"][c:].reshape(1, c).astype(jnp.float32)
    return {"w1t": w1t, "b1": b1,
            "w2t_mu": w2t_mu, "b2_mu": b2_mu,
            "w2t_lv": w2t_lv, "b2_lv": b2_lv,
            "code_size": c}


# ----------------------------------------------------------------------------
# ZPrior forward
# ----------------------------------------------------------------------------

def zprior_forward(packed, inputs):
    """inputs: (B, input_size) or (N0, B, input_size).

    Returns (mu, logvar), each (..., B, code_size) with the PyTorch leading dim.
    """
    if inputs.ndim == 2:                       # torch: inputs.unsqueeze_(0)
        inputs = inputs[None]
    lead = inputs.shape[:-1]
    in_size = inputs.shape[-1]
    n_rows = 1
    for d in lead:
        n_rows *= d

    x2d = inputs.reshape(n_rows, in_size).astype(jnp.bfloat16)
    mu2d, lv2d = _zprior_apply(x2d, packed)    # (N, C), (N, C)
    c = packed["code_size"]
    mu = mu2d.reshape(*lead, c)                # torch.chunk(..., 2, dim=2): mu head
    logvar = lv2d.reshape(*lead, c)            # logvar head
    return mu, logvar


def zprior_reference(params, inputs):
    """Pure-JAX f32 reference matching the PyTorch module exactly."""
    if inputs.ndim == 2:
        inputs = inputs[None]
    h = jnp.maximum(inputs @ params["fc1_w"].T + params["fc1_b"], 0.0)
    y = h @ params["fc2_w"].T + params["fc2_b"]
    return jnp.split(y, 2, axis=2)


# ----------------------------------------------------------------------------
# Demo
# ----------------------------------------------------------------------------

if __name__ == "__main__":
    input_size, hidden_size, code_size = 8, 32, 16   # label-embed -> hidden -> 2*code
    batch = 2

    key = jax.random.PRNGKey(0)
    pkey, xkey = jax.random.split(key)
    params = init_params(pkey, input_size, hidden_size, code_size)
    packed = pack_params(params)

    x = jax.random.normal(xkey, (batch, input_size), jnp.float32)

    mu, logvar = zprior_forward(packed, x)
    jax.block_until_ready((mu, logvar))

    # Shape checks (PyTorch: unsqueeze to (1, B, 2C) then chunk along dim=2)
    assert mu.shape == (1, batch, code_size)
    assert logvar.shape == (1, batch, code_size)
    assert bool(jnp.all(jnp.isfinite(mu))) and bool(jnp.all(jnp.isfinite(logvar)))

    # Numerical check against the pure-JAX f32 reference of the PyTorch module
    # (bf16 matmul operands with f32 accumulation -> loosened tolerances).
    mu_ref, logvar_ref = zprior_reference(params, x)
    assert bool(jnp.allclose(mu, mu_ref, atol=2e-2, rtol=2e-2))
    assert bool(jnp.allclose(logvar, logvar_ref, atol=2e-2, rtol=2e-2))

    print("KERNEL_OK")
</pallas_src>

<mosaic_0001>
module attributes {stable_mosaic.version = 11 : i64} {
  func.func @_zprior_kernel(%arg0: i32, %arg1: memref<8x8xbf16, #tpu.memory_space<vmem>>, %arg2: memref<8x32xbf16, #tpu.memory_space<vmem>>, %arg3: memref<1x32xf32, #tpu.memory_space<vmem>>, %arg4: memref<32x16xbf16, #tpu.memory_space<vmem>>, %arg5: memref<1x16xf32, #tpu.memory_space<vmem>>, %arg6: memref<32x16xbf16, #tpu.memory_space<vmem>>, %arg7: memref<1x16xf32, #tpu.memory_space<vmem>>, %arg8: memref<8x16xf32, #tpu.memory_space<vmem>>, %arg9: memref<8x16xf32, #tpu.memory_space<vmem>>) attributes {dimension_semantics = [#tpu.dimension_semantics<parallel>], iteration_bounds = array<i64: 1>, scalar_prefetch = 0 : i64, scratch_operands = 0 : i64, tpu.core_type = #tpu.core_type<tc>, window_params = [{transform_indices = @transform_0, window_bounds = array<i64: 8, 8>}, {pipeline_mode = #tpu.pipeline_mode<synchronous>, transform_indices = @transform_1, window_bounds = array<i64: 8, 32>}, {pipeline_mode = #tpu.pipeline_mode<synchronous>, transform_indices = @transform_2, window_bounds = array<i64: 1, 32>}, {pipeline_mode = #tpu.pipeline_mode<synchronous>, transform_indices = @transform_3, window_bounds = array<i64: 32, 16>}, {pipeline_mode = #tpu.pipeline_mode<synchronous>, transform_indices = @transform_4, window_bounds = array<i64: 1, 16>}, {pipeline_mode = #tpu.pipeline_mode<synchronous>, transform_indices = @transform_5, window_bounds = array<i64: 32, 16>}, {pipeline_mode = #tpu.pipeline_mode<synchronous>, transform_indices = @transform_6, window_bounds = array<i64: 1, 16>}, {transform_indices = @transform_7, window_bounds = array<i64: 8, 16>}, {transform_indices = @transform_8, window_bounds = array<i64: 8, 16>}]} {
    %c0 = arith.constant 0 : index
    %c0_0 = arith.constant 0 : index
    %0 = vector.load %arg1[%c0, %c0_0] : memref<8x8xbf16, #tpu.memory_space<vmem>>, vector<8x8xbf16>
    %c0_1 = arith.constant 0 : index
    %c0_2 = arith.constant 0 : index
    %1 = vector.load %arg2[%c0_1, %c0_2] : memref<8x32xbf16, #tpu.memory_space<vmem>>, vector<8x32xbf16>
    %cst = arith.constant dense<0.000000e+00> : vector<8x32xf32>
    %2 = tpu.matmul %0, %1, %cst {dimension_numbers = #tpu.dot_dimension_numbers<[1], [0], [0], [1], [0, 0, 1, 1], [], []>} : vector<8x8xbf16>, vector<8x32xbf16>, vector<8x32xf32> -> vector<8x32xf32>
    %c0_3 = arith.constant 0 : index
    %c0_4 = arith.constant 0 : index
    %3 = vector.load %arg3[%c0_3, %c0_4] : memref<1x32xf32, #tpu.memory_space<vmem>>, vector<1x32xf32>
    %4 = vector.broadcast %3 : vector<1x32xf32> to vector<8x32xf32>
    %5 = arith.addf %2, %4 : vector<8x32xf32>
    %cst_5 = arith.constant 0.000000e+00 : f32
    %6 = vector.broadcast %cst_5 : f32 to vector<8x32xf32>
    %7 = arith.maximumf %5, %6 : vector<8x32xf32>
    %8 = arith.truncf %7 : vector<8x32xf32> to vector<8x32xbf16>
    %c0_6 = arith.constant 0 : index
    %c0_7 = arith.constant 0 : index
    %9 = vector.load %arg4[%c0_6, %c0_7] : memref<32x16xbf16, #tpu.memory_space<vmem>>, vector<32x16xbf16>
    %cst_8 = arith.constant dense<0.000000e+00> : vector<8x16xf32>
    %10 = tpu.matmul %8, %9, %cst_8 {dimension_numbers = #tpu.dot_dimension_numbers<[1], [0], [0], [1], [0, 0, 1, 1], [], []>} : vector<8x32xbf16>, vector<32x16xbf16>, vector<8x16xf32> -> vector<8x16xf32>
    %c0_9 = arith.constant 0 : index
    %c0_10 = arith.constant 0 : index
    %11 = vector.load %arg6[%c0_9, %c0_10] : memref<32x16xbf16, #tpu.memory_space<vmem>>, vector<32x16xbf16>
    %cst_11 = arith.constant dense<0.000000e+00> : vector<8x16xf32>
    %12 = tpu.matmul %8, %11, %cst_11 {dimension_numbers = #tpu.dot_dimension_numbers<[1], [0], [0], [1], [0, 0, 1, 1], [], []>} : vector<8x32xbf16>, vector<32x16xbf16>, vector<8x16xf32> -> vector<8x16xf32>
    %c0_12 = arith.constant 0 : index
    %c0_13 = arith.constant 0 : index
    %13 = vector.load %arg5[%c0_12, %c0_13] : memref<1x16xf32, #tpu.memory_space<vmem>>, vector<1x16xf32>
    %14 = vector.broadcast %13 : vector<1x16xf32> to vector<8x16xf32>
    %15 = arith.addf %10, %14 : vector<8x16xf32>
    %c0_14 = arith.constant 0 : index
    %c0_15 = arith.constant 0 : index
    %16 = vector.load %arg8[%c0_14, %c0_15] : memref<8x16xf32, #tpu.memory_space<vmem>>, vector<8x16xf32>
    tpu.vector_store %arg8[%c0_14, %c0_15], %15 {strides = array<i32>} : memref<8x16xf32, #tpu.memory_space<vmem>>, vector<8x16xf32>,
    %c0_16 = arith.constant 0 : index
    %c0_17 = arith.constant 0 : index
    %17 = vector.load %arg7[%c0_16, %c0_17] : memref<1x16xf32, #tpu.memory_space<vmem>>, vector<1x16xf32>
    %18 = vector.broadcast %17 : vector<1x16xf32> to vector<8x16xf32>
    %19 = arith.addf %12, %18 : vector<8x16xf32>
    %c0_18 = arith.constant 0 : index
    %c0_19 = arith.constant 0 : index
    %20 = vector.load %arg9[%c0_18, %c0_19] : memref<8x16xf32, #tpu.memory_space<vmem>>, vector<8x16xf32>
    tpu.vector_store %arg9[%c0_18, %c0_19], %19 {strides = array<i32>} : memref<8x16xf32, #tpu.memory_space<vmem>>, vector<8x16xf32>,
    return
  }
  func.func @transform_0(%arg0: i32) -> (i32, i32) {
    %c0_i32 = arith.constant 0 : i32
    %c0_i32_0 = arith.constant 0 : i32
    return %arg0, %c0_i32 : i32, i32
  }
  func.func @transform_1(%arg0: i32) -> (i32, i32) {
    %c0_i32 = arith.constant 0 : i32
    %c0_i32_0 = arith.constant 0 : i32
    %c0_i32_1 = arith.constant 0 : i32
    return %c0_i32, %c0_i32_0 : i32, i32
  }
  func.func @transform_2(%arg0: i32) -> (i32, i32) {
    %c0_i32 = arith.constant 0 : i32
    %c0_i32_0 = arith.constant 0 : i32
    %c0_i32_1 = arith.constant 0 : i32
    return %c0_i32, %c0_i32_0 : i32, i32
  }
  func.func @transform_3(%arg0: i32) -> (i32, i32) {
    %c0_i32 = arith.constant 0 : i32
    %c0_i32_0 = arith.constant 0 : i32
    %c0_i32_1 = arith.constant 0 : i32
    return %c0_i32, %c0_i32_0 : i32, i32
  }
  func.func @transform_4(%arg0: i32) -> (i32, i32) {
    %c0_i32 = arith.constant 0 : i32
    %c0_i32_0 = arith.constant 0 : i32
    %c0_i32_1 = arith.constant 0 : i32
    return %c0_i32, %c0_i32_0 : i32, i32
  }
  func.func @transform_5(%arg0: i32) -> (i32, i32) {
    %c0_i32 = arith.constant 0 : i32
    %c0_i32_0 = arith.constant 0 : i32
    %c0_i32_1 = arith.constant 0 : i32
    return %c0_i32, %c0_i32_0 : i32, i32
  }
  func.func @transform_6(%arg0: i32) -> (i32, i32) {
    %c0_i32 = arith.constant 0 : i32
    %c0_i32_0 = arith.constant 0 : i32
    %c0_i32_1 = arith.constant 0 : i32
    return %c0_i32, %c0_i32_0 : i32, i32
  }
  func.func @transform_7(%arg0: i32) -> (i32, i32) {
    %c0_i32 = arith.constant 0 : i32
    %c0_i32_0 = arith.constant 0 : i32
    return %arg0, %c0_i32 : i32, i32
  }
  func.func @transform_8(%arg0: i32) -> (i32, i32) {
    %c0_i32 = arith.constant 0 : i32
    %c0_i32_0 = arith.constant 0 : i32
    return %arg0, %c0_i32 : i32, i32
  }
}

</mosaic_0001>

<bundles_post_ra>
// kernel: tpu_custom_call.1
= control target key start
LH: loop header
LB: loop body
LE: loop exit
PB: predicated region body
PF: predicated region fallthrough
CT: control target
= control target key end

     0   :  { %14 = vsyncpa [#allocation3], 0  ;;  %vm44_vm0 = vcmask 1043456   ;;  %v343_v1 = vmov 0.0   ;;  %vm344_vm1 = vmmov 0   ;;  %vm40_vm2 = vcmask 64512   ;;  %s425_s0 = inlined_call_operand.vmem [shape: bf16[8,8], index: 0, kind: input, shape index: {}]   ;;  %s426_s1 = inlined_call_operand.vmem [shape: bf16[8,32], index: 1, kind: input, shape index: {}]   ;;  %s427_s2 = inlined_call_operand.vmem [shape: f32[1,32], index: 2, kind: input, shape index: {}]   ;;  %s428_s3 = inlined_call_operand.vmem [shape: bf16[32,16], index: 3, kind: input, shape index: {}]   ;;  %s429_s4 = inlined_call_operand.vmem [shape: f32[1,16], index: 4, kind: input, shape index: {}]   ;;  %s430_s5 = inlined_call_operand.vmem [shape: bf16[32,16], index: 5, kind: input, shape index: {}]   ;;  %s431_s6 = inlined_call_operand.vmem [shape: f32[1,16], index: 6, kind: input, shape index: {}]   ;;  %s432_s7 = inlined_call_operand.hbm [shape: f32[8,16], index: 7, kind: output, shape index: {0}]   ;;  %s433_s8 = inlined_call_operand.hbm [shape: f32[8,16], index: 8, kind: output, shape index: {1}]  }
   0x1   :  { %v32_v0 = vld [vmem:[%s426_s1] sm:$0xf]  ;;  %269 = vmatprep.subr.bf16.mxu0 %v343_v1  ;;  %271 = vmatprep.mubr.msk.bf16.mxu0 %vm344_vm1, %v343_v1  ;;  %v295_v4 = vld [vmem:[%s430_s5 + $0x8] sm:$0xff]  }
   0x2   :  { %v46_v2 = vsel %vm44_vm0, %v32_v0, 0  ;;  %v31_v3 = vld [vmem:[%s425_s0] sm:$0xf]  ;;  %275 = vmatprep.subr.bf16.mxu1 %v343_v1  ;;  %279 = vmatprep.mubr.msk.bf16.mxu1 %vm344_vm1, %v343_v1 }
   0x3   :  { %270 = vmatpush3.bf16.msra.mxu0 %v46_v2 }
   0x4   :  { %283 = vmatprep.subr.bf16.mxu0 %v343_v1 }
   0x5   :  { %15 = vsyncpa [#allocation5], 0  ;;  %v296_v5 = vld [vmem:[%s428_s3 + $0x8] sm:$0xff]   ;;  %v297_v6 = vld [vmem:[%s430_s5] sm:$0xff]   ;;  %vm117_vm3 = vcmask 261120   ;;  %s345_s19 = smov [#allocation2]  }
   0x6   :  { %272 = vmatmul.mubr.msk.bf16.vlgmr.msra.gmra.mxu0 %vm40_vm2, %v31_v3  ;;  %276 = vmatpush3.bf16.msra.mxu1 %v296_v5  ;;  %v298_v7 = vld [vmem:[%s428_s3] sm:$0xff]   ;;  %s346_s20 = smov [#allocation4]   ;;  %vm161_vm4 = vcmask 130048  }
   0x7   :  { %284 = vmatpush3.bf16.msra.mxu0 %v295_v4  ;;  %287 = vmatprep.mubr.msk.bf16.mxu0 %vm344_vm1, %v343_v1  ;;  %v251_v8 = vld [vmem:[%s427_s2] ss:$0 sm:$0xff]  ;;  %s229_s2 = sshll.u32 %s345_s19, 4  ;;  %s239_s21 = sshll.u32 %s346_s20, 4  ;;  %s230_s2 = int_to_ptr.vmem [resolvable:$true] %s229_s2  ;;  %s240_s21 = int_to_ptr.vmem [resolvable:$true] %s239_s21 }
   0x8   :  { %285 = vmatprep.subr.bf16.mxu0 %v343_v1  ;;  %277 = vmatprep.subr.bf16.mxu1 %v343_v1  ;;  %v253_v16 = vld [vmem:[%s429_s4] ss:$0 sm:$0xff]  ;;  %s299_s4 = scalar_lea.vmem %s230_s2, 128  ;;  %p304_p1 = scmp.lt.s32.totalorder %s230_s2, %s230_s2 }
   0x9   :  { %v257_v17 = vld [vmem:[%s431_s6] ss:$0 sm:$0xff]  ;;  %p300_p0 = scmp.ne.s32.totalorder %s230_s2, %s299_s4  ;;  %p305_p2 = scmp.lt.s32.totalorder %s299_s4, %s299_s4 }
   0xa   :  { %278 = vmatpush3.bf16.msra.mxu1 %v298_v7 }
   0xb   :  { %286 = vmatpush3.bf16.msra.mxu0 %v297_v6  ;;  %p306_p3 = por %p305_p2, %p304_p1 }
   0xd   :  { %p307_p4 = pnand %p306_p3, %p300_p0 }
  0xc6   :  { %v82_v9 = vpop.f32.mrf.mxu0 }
  0xc7   :  { %v83_v10 = vadd.f32 %v251_v8, %v82_v9 }
  0xc8   :  { %v273_v11 = vpop.f32.mrf.mxu0 }
  0xc9   :  { %v88_v12 = vmax.f32 %v83_v10, 0.0 }
  0xca   :  { %v85_v13 = vpop.f32.mrf.mxu0 }
  0xcb   :  { %v89_v14 = vpack.c.bf16 %v88_v12, %v88_v12 }
  0xcc   :  { %v274_v15 = vpop.f32.mrf.mxu0 }
  0xcd   :  { %280 = vmatmul.mubr.msk.bf16.vlgmr.msra.gmra.mxu1 %vm117_vm3, %v89_v14  ;;  %288 = vmatmul.mubr.msk.bf16.vlgmr.msra.gmra.mxu0 %vm117_vm3, %v89_v14 }
 0x18d   :  { %v155_v18 = vpop.f32.mrf.mxu1  ;;  %v216_v19 = vpop.f32.mrf.mxu0 }
 0x18e   :  { %v156_v20 = vadd.f32 %v253_v16, %v155_v18  ;;  %v217_v21 = vadd.f32 %v257_v17, %v216_v19 }
 0x18f   :  { %v281_v22 = vpop.f32.mrf.mxu1  ;;  %v289_v23 = vpop.f32.mrf.mxu0 }
 0x190   :  { %162 = vst.msk [vmem:[#allocation2] sm:$0xff] %vm161_vm4, %v156_v20  ;;  %222 = vst.msk [vmem:[#allocation4] sm:$0xff] %vm161_vm4, %v217_v21 }
 0x191   :  { %v158_v24 = vpop.f32.mrf.mxu1  ;;  %v219_v25 = vpop.f32.mrf.mxu0 }
 0x192   :  { %310 = shalt.err (!%p307_p4)
}
 0x193   :  { %232 = dma.vmem_to_hbm [thread:$0]  %s230_s2, 128, %s432_s7, [#allocation3]  }
 0x194   :  { %s319_s23 = scalar_lea.vmem %s240_s21, 128  ;;  %p324_p6 = scmp.lt.s32.totalorder %s240_s21, %s240_s21 }
 0x195   :  { %p320_p5 = scmp.ne.s32.totalorder %s240_s21, %s319_s23  ;;  %p325_p7 = scmp.lt.s32.totalorder %s319_s23, %s319_s23 }
 0x197   :  { %p326_p8 = por %p325_p7, %p324_p6 }
 0x199   :  { %p327_p9 = pnand %p326_p8, %p320_p5 }
 0x19b   :  { %330 = shalt.err (!%p327_p9)
}
 0x19c   :  { %242 = dma.vmem_to_hbm [thread:$0]  %s240_s21, 128, %s433_s8, [#allocation5]   ;;  %v282_v26 = vpop.f32.mrf.mxu1  ;;  %v290_v27 = vpop.f32.mrf.mxu0 }
 0x19d   :  { %339 = dma.done.wait [#allocation3], 128  }
 0x19e   :  { %340 = vsyncadd [#allocation3], 4294967168 }
 0x19f   :  { %341 = dma.done.wait [#allocation5], 128  }
 0x1a0   :  { %342 = vsyncadd [#allocation5], 4294967168 }
 0x1a1   :  { %249 = vsyncpa [#allocation3], 1 }
 0x1a2   :  { %250 = vsyncpa [#allocation5], 1 }

</bundles_post_ra>
